<compile_context>
chip_gen: v7x
topology: tpu7x:2x2x1
jax: 0.10.0
libtpu: 0.0.40
codegen_flags: <defaults>
</compile_context>

<pallas_src>
import jax
import jax.numpy as jnp
from jax import lax
from jax.experimental import pallas as pl
from jax.experimental.pallas import tpu as pltpu


def bahdanau_sa_kernel(h_ref, w1_ref, w2_ref, o_ref):
    h = h_ref[0]          # [T, rnn_hidden]      (one batch element)
    w1 = w1_ref[...]      # [out_hid, rnn_hidden] (PyTorch layout, untouched)
    w2 = w2_ref[...]      # [r, out_hid]          (PyTorch layout, untouched)

    # w1 @ Hᵀ without materializing a transpose: contract last dims of both.
    # Result a: [out_hid, T]
    a = lax.dot_general(
        w1, h,
        dimension_numbers=(((1,), (1,)), ((), ())),
        preferred_element_type=jnp.float32,
    )
    a = jnp.tanh(a)       # EUP

    # w2 @ a  ->  [r, T]
    s = jnp.dot(w2, a, preferred_element_type=jnp.float32)

    # softmax over the last (lane) axis == PyTorch softmax(dim=2)
    m = jnp.max(s, axis=-1, keepdims=True)
    e = jnp.exp(s - m)
    denom = jnp.sum(e, axis=-1, keepdims=True)
    o_ref[0] = (e / denom).astype(o_ref.dtype)


def bahdanau_sa_forward(H, w1, w2):
    """H: [B, T, rnn_hidden] f32, w1: [out_hid, rnn_hidden] f32,
    w2: [r, out_hid] f32.  Returns [B, r, T] f32 attention weights."""
    B, T, rnn_hidden = H.shape
    out_hid = w1.shape[0]
    r = w2.shape[0]

    grid_spec = pltpu.PrefetchScalarGridSpec(
        num_scalar_prefetch=0,
        grid=(B,),
        in_specs=[
            # One batch element per program (full T x rnn_hidden tile).
            pl.BlockSpec((1, T, rnn_hidden), lambda b: (b, 0, 0)),
            # Weights: constant index_map -> fetched once, resident in VMEM.
            pl.BlockSpec((out_hid, rnn_hidden), lambda b: (0, 0)),
            pl.BlockSpec((r, out_hid), lambda b: (0, 0)),
        ],
        out_specs=pl.BlockSpec((1, r, T), lambda b: (b, 0, 0)),
    )

    return pl.pallas_call(
        bahdanau_sa_kernel,
        out_shape=jax.ShapeDtypeStruct((B, r, T), jnp.float32),
        grid_spec=grid_spec,
        compiler_params=pltpu.CompilerParams(
            dimension_semantics=("parallel",),   # per-batch programs are independent
        ),
    )(H, w1, w2)


if __name__ == "__main__":
    # Small but TPU-friendly shapes: T and rnn_hidden are multiples of 128
    # (lane-dense output / full-K MXU feed), r matches one sublane group.
    batch, seq_len, rnn_hidden, out_hid, r = 2, 128, 128, 64, 8

    key = jax.random.PRNGKey(0)
    k_h, k_w1, k_w2 = jax.random.split(key, 3)
    H = jax.random.normal(k_h, (batch, seq_len, rnn_hidden), dtype=jnp.float32)
    w1 = jax.random.normal(k_w1, (out_hid, rnn_hidden), dtype=jnp.float32)  # torch.randn
    w2 = jax.random.normal(k_w2, (r, out_hid), dtype=jnp.float32)           # torch.randn

    out = bahdanau_sa_forward(H, w1, w2)
    jax.block_until_ready(out)

    # Pure-JAX reference of the same forward pass.
    a_ref = jnp.tanh(jnp.einsum("ok,btk->bot", w1, H,
                                precision=lax.Precision.HIGHEST))
    s_ref = jnp.einsum("ro,bot->brt", w2, a_ref,
                       precision=lax.Precision.HIGHEST)
    ref = jax.nn.softmax(s_ref, axis=-1)

    assert out.shape == (batch, r, seq_len)
    assert out.dtype == jnp.float32
    assert bool(jnp.all(jnp.isfinite(out)))
    row_sums = jnp.sum(out, axis=-1)
    assert bool(jnp.all(jnp.abs(row_sums - 1.0) < 1e-3))
    assert bool(jnp.max(jnp.abs(out - ref)) < 5e-2)
    print("KERNEL_OK")
</pallas_src>

<mosaic_0001>
module attributes {stable_mosaic.version = 11 : i64} {
  func.func @bahdanau_sa_kernel(%arg0: i32, %arg1: memref<1x128x128xf32, #tpu.memory_space<vmem>>, %arg2: memref<64x128xf32, #tpu.memory_space<vmem>>, %arg3: memref<8x64xf32, #tpu.memory_space<vmem>>, %arg4: memref<1x8x128xf32, #tpu.memory_space<vmem>>) attributes {dimension_semantics = [#tpu.dimension_semantics<parallel>], iteration_bounds = array<i64: 2>, scalar_prefetch = 0 : i64, scratch_operands = 0 : i64, tpu.core_type = #tpu.core_type<tc>, window_params = [{transform_indices = @transform_0, window_bounds = array<i64: 1, 128, 128>}, {pipeline_mode = #tpu.pipeline_mode<synchronous>, transform_indices = @transform_1, window_bounds = array<i64: 64, 128>}, {pipeline_mode = #tpu.pipeline_mode<synchronous>, transform_indices = @transform_2, window_bounds = array<i64: 8, 64>}, {transform_indices = @transform_3, window_bounds = array<i64: 1, 8, 128>}]} {
    %c0 = arith.constant 0 : index
    %c0_0 = arith.constant 0 : index
    %c0_1 = arith.constant 0 : index
    %0 = vector.load %arg1[%c0, %c0_0, %c0_1] : memref<1x128x128xf32, #tpu.memory_space<vmem>>, vector<1x128x128xf32>
    %1 = vector.shape_cast %0 : vector<1x128x128xf32> to vector<128x128xf32>
    %c0_2 = arith.constant 0 : index
    %c0_3 = arith.constant 0 : index
    %2 = vector.load %arg2[%c0_2, %c0_3] : memref<64x128xf32, #tpu.memory_space<vmem>>, vector<64x128xf32>
    %c0_4 = arith.constant 0 : index
    %c0_5 = arith.constant 0 : index
    %3 = vector.load %arg3[%c0_4, %c0_5] : memref<8x64xf32, #tpu.memory_space<vmem>>, vector<8x64xf32>
    %cst = arith.constant dense<0.000000e+00> : vector<64x128xf32>
    %4 = tpu.matmul %2, %1, %cst {dimension_numbers = #tpu.dot_dimension_numbers<[1], [1], [0], [0], [0, 0, 1, 0], [], []>} : vector<64x128xf32>, vector<128x128xf32>, vector<64x128xf32> -> vector<64x128xf32>
    %5 = math.tanh %4 : vector<64x128xf32>
    %cst_6 = arith.constant dense<0.000000e+00> : vector<8x128xf32>
    %6 = tpu.matmul %3, %5, %cst_6 {dimension_numbers = #tpu.dot_dimension_numbers<[1], [0], [0], [1], [0, 0, 1, 1], [], []>} : vector<8x64xf32>, vector<64x128xf32>, vector<8x128xf32> -> vector<8x128xf32>
    %cst_7 = arith.constant dense<0xFF800000> : vector<8xf32>
    %7 = vector.multi_reduction <maximumf>, %6, %cst_7 [1] : vector<8x128xf32> to vector<8xf32>
    %8 = vector.shape_cast %7 : vector<8xf32> to vector<8x1xf32>
    %9 = vector.broadcast %8 : vector<8x1xf32> to vector<8x128xf32>
    %10 = arith.subf %6, %9 : vector<8x128xf32>
    %11 = math.exp %10 : vector<8x128xf32>
    %cst_8 = arith.constant dense<0.000000e+00> : vector<8xf32>
    %12 = vector.multi_reduction <add>, %11, %cst_8 [1] : vector<8x128xf32> to vector<8xf32>
    %13 = vector.shape_cast %12 : vector<8xf32> to vector<8x1xf32>
    %14 = vector.broadcast %13 : vector<8x1xf32> to vector<8x128xf32>
    %15 = arith.divf %11, %14 : vector<8x128xf32>
    %c0_9 = arith.constant 0 : index
    %c0_10 = arith.constant 0 : index
    %c0_11 = arith.constant 0 : index
    %16 = vector.load %arg4[%c0_9, %c0_10, %c0_11] : memref<1x8x128xf32, #tpu.memory_space<vmem>>, vector<1x8x128xf32>
    %17 = vector.shape_cast %16 : vector<1x8x128xf32> to vector<8x128xf32>
    %18 = vector.shape_cast %15 : vector<8x128xf32> to vector<1x8x128xf32>
    tpu.vector_store %arg4[%c0_9, %c0_10, %c0_11], %18 {strides = array<i32>} : memref<1x8x128xf32, #tpu.memory_space<vmem>>, vector<1x8x128xf32>,
    return
  }
  func.func @transform_0(%arg0: i32) -> (i32, i32, i32) {
    %c0_i32 = arith.constant 0 : i32
    %c0_i32_0 = arith.constant 0 : i32
    %c0_i32_1 = arith.constant 0 : i32
    return %arg0, %c0_i32, %c0_i32_0 : i32, i32, i32
  }
  func.func @transform_1(%arg0: i32) -> (i32, i32) {
    %c0_i32 = arith.constant 0 : i32
    %c0_i32_0 = arith.constant 0 : i32
    %c0_i32_1 = arith.constant 0 : i32
    return %c0_i32, %c0_i32_0 : i32, i32
  }
  func.func @transform_2(%arg0: i32) -> (i32, i32) {
    %c0_i32 = arith.constant 0 : i32
    %c0_i32_0 = arith.constant 0 : i32
    %c0_i32_1 = arith.constant 0 : i32
    return %c0_i32, %c0_i32_0 : i32, i32
  }
  func.func @transform_3(%arg0: i32) -> (i32, i32, i32) {
    %c0_i32 = arith.constant 0 : i32
    %c0_i32_0 = arith.constant 0 : i32
    %c0_i32_1 = arith.constant 0 : i32
    return %arg0, %c0_i32, %c0_i32_0 : i32, i32, i32
  }
}

</mosaic_0001>

<bundles_post_ra>
// kernel: tpu_custom_call.1
= control target key start
LH: loop header
LB: loop body
LE: loop exit
PB: predicated region body
PF: predicated region fallthrough
CT: control target
= control target key end

     0   :  { %8 = vsyncpa [#allocation3], 0  ;;  %s1236_s0 = inlined_call_operand.hbm [shape: f32[2,128,128], index: 0, kind: input, shape index: {}]   ;;  %s1237_s1 = inlined_call_operand.hbm [shape: f32[64,128], index: 1, kind: input, shape index: {}]   ;;  %s1238_s2 = inlined_call_operand.hbm [shape: f32[8,64], index: 2, kind: input, shape index: {}]   ;;  %s1239_s3 = inlined_call_operand.hbm [shape: f32[2,8,128], index: 3, kind: output, shape index: {}]  }
   0x1   :  { %10 = vsyncpa [#allocation3 + $0x1], 0 }
   0x2   :  { %11 = vsyncpa [#allocation6], 0 }
   0x3   :  { %12 = vsyncpa [#allocation4], 0 }
   0x4   :  { %14 = vsyncpa [#allocation4 + $0x1], 0  ;;  %s979_s12 = smov 0   ;;  %s981_s13 = smov 0  }
   0x5   :  { %s983_s14 = smov 0   ;;  %s985_s15 = smov 0  }
   0x6 LB: > { %s1000_s16 = sadd.s32 4294967295, %s948_s15   ;;  %s541_s17 = sadd.s32 4294967294, %s948_s15   ;;  %s948_s15 = sphi %s985_s15, %s1259_s15   ;;  %s944_s14 = sphi %s983_s14, %s1258_s14   ;;  %s940_s13 = sphi %s981_s13, %s1257_s13   ;;  %s936_s12 = sphi %s979_s12, %s1256_s12  }
   0x7   : > { %p40_p0 = scmp.ne.s32.totalorder %s940_s13, %s936_s12  ;;  %p1240_p1 = scmp.eq.s32.totalorder %s1000_s16, 0 }
   0x8   : > { %p112_p3 = scmp.eq.s32.totalorder %s541_s17, 1  ;;  %p542_p5 = scmp.ge.s32.totalorder %s948_s15, 1 }
   0x9   : > { %p1009_p4 = por %p1240_p1, %p40_p0  ;;  %p119_p7 = scmp.lt.s32.totalorder %s948_s15, 3 }
   0xa   : > { %p1014_p6 = por %p112_p3, %p40_p0  ;;  %s950_s21 = smov [#allocation5]  }
   0xb   : > { %s1243_s18 = scalar_select %p1009_p4, 1, 0 }
   0xc   : > { %s1244_s19 = scalar_select %p1014_p6, 1, 0 }
   0xd   : > { %p1019_p8 = pnand %p542_p5, %p119_p7  ;;  %s131_s22 = sshll.u32 %s950_s21, 4  ;;  %s1023_s22 = int_to_ptr.vmem [resolvable:$true] %s131_s22 }
   0xe   : > { %s951_s24 = smov [#allocation7]   ;;  %s792_s28 = scalar_lea.hbm %s1237_s1, 1024 }
   0xf   : > { %p712_p9 = pneg %p1019_p8  ;;  %s145_s25 = sshll.u32 %s951_s24, 4  ;;  %s1034_s25 = int_to_ptr.vmem [resolvable:$true] %s145_s25 }
  0x10   : > { %p793_p12 = scmp.ne.s32.totalorder %s1237_s1, %s792_s28  ;;  %p799_p5 = scmp.lt.u32.totalorder %s792_s28, %s1237_s1 }
  0x11   : > { %p1030_p11 = pnand %p712_p9, %p1240_p1 }
  0x13   : > { %p794_p13 = pneg %p1030_p11 }
  0x15   : > { %p795_p0 = pnand %p794_p13, %p793_p12 }
  0x17   : > { %p796_p3 = pneg %p795_p0 }
  0x19   : > { %p801_p7 = pnand %p799_p5, %p796_p3 }
  0x1b   : > { %804 = shalt.err (!%p801_p7)
}
  0x1c   : > { %s805_s6 = scalar_lea.vmem %s1023_s22, 1024  ;;  %p813_p2 = scmp.lt.s32.totalorder %s1023_s22, %s1023_s22 }
  0x1d   : > { %p806_p9 = scmp.ne.s32.totalorder %s1023_s22, %s805_s6  ;;  %p814_p12 = scmp.lt.s32.totalorder %s805_s6, %s805_s6 }
  0x1f   : > { %p808_p10 = pnand %p806_p9, %p794_p13  ;;  %p815_p0 = por %p814_p12, %p813_p2 }
  0x21   : > { %p809_p1 = pneg %p808_p10 }
  0x23   : > { %p816_p6 = pnand %p815_p0, %p809_p1 }
  0x25   : > { %819 = shalt.err (!%p816_p6)
}
  0x26   : > { %s952_s7 = smov 128   ;;  %s953_s8 = smov 8  }
  0x27   : > { %715 = dma.hbm_to_vmem [thread:$0]  (!%p1030_p11), %s1237_s1, 1024, %s1023_s22, [#allocation6], %s952_s7, %s952_s7, %s953_s8  }
  0x28   : > { %s820_s21 = scalar_lea.hbm %s1238_s2, 128 }
  0x29   : > { %p821_p1 = scmp.ne.s32.totalorder %s1238_s2, %s820_s21  ;;  %p827_p10 = scmp.lt.u32.totalorder %s820_s21, %s1238_s2 }
  0x2b   : > { %p823_p2 = pnand %p821_p1, %p794_p13 }
  0x2d   : > { %p824_p6 = pneg %p823_p2 }
  0x2f   : > { %p829_p3 = pnand %p827_p10, %p824_p6 }
  0x31   : > { %832 = shalt.err (!%p829_p3)
}
  0x32   : > { %s833_s22 = scalar_lea.vmem %s1034_s25, 128  ;;  %p841_p12 = scmp.lt.s32.totalorder %s1034_s25, %s1034_s25 }
  0x33   : > { %p834_p5 = scmp.ne.s32.totalorder %s1034_s25, %s833_s22  ;;  %p842_p0 = scmp.lt.s32.totalorder %s833_s22, %s833_s22 }
  0x35   : > { %p836_p7 = pnand %p834_p5, %p794_p13  ;;  %p843_p1 = por %p842_p0, %p841_p12 }
  0x37   : > { %p837_p9 = pneg %p836_p7 }
  0x39   : > { %p844_p2 = pnand %p843_p1, %p837_p9 }
  0x3b   : > { %847 = shalt.err (!%p844_p2)
}
  0x3c   : > { %718 = dma.hbm_to_vmem [thread:$0]  (!%p1030_p11), %s1238_s2, 128, %s1034_s25, [#allocation6]  }
  0x3d   : > { %s1092_s4 = sadd.s32 1, %s948_s15   ;;  %s27_s23 = sadd.s32 1, %s944_s14 }
  0x3e   : > { %s24_s5 = ssub.s32 %s948_s15, %s1092_s4  ;;  %p34_p13 = scmp.ne.s32.totalorder %s944_s14, %s940_s13 }
  0x3f   : > { %p25_p6 = scmp.eq.s32.totalorder %s24_s5, 0  ;;  %p35_p10 = scmp.eq.s32.totalorder %s948_s15, 0 }
  0x40   : > { %p1247_p3 = scmp.eq.s32.totalorder %s1000_s16, 1  ;;  %p729_p7 = scmp.lt.s32.totalorder %s948_s15, 2 }
  0x41   : > { %s1108_s9 = scalar_select %p25_p6, %s944_s14, %s27_s23  }
  0x42   : > { %p1102_p5 = por %p1247_p3, %p34_p13  ;;  %p36_p9 = por %p35_p10, %p34_p13 }
  0x43   : > { %s156_s10 = sand.u32 1, %s944_s14   ;;  %s559_s25 = sshll.u32 %s948_s15, 11 }
  0x44   : > { %s1248_s6 = scalar_select %p1102_p5, 1, 0 }
  0x45   : > { %s546_s11 = sshll.u32 %s156_s10, 7  ;;  %s1115_s24 = scalar_lea.hbm %s1236_s0, %s559_s25 }
  0x46   : > { %s160_s26 = scalar_lea.vmem [#allocation2], %s546_s11  ;;  %p1119_p11 = pnand %p729_p7, %p36_p9 }
  0x47   : > { %s167_s27 = sshll.u32 %s160_s26, 4  ;;  %s1123_s22 = scalar_lea.sflag [#allocation3], %s156_s10  ;;  %s1117_s27 = int_to_ptr.vmem [resolvable:$true] %s167_s27 }
  0x48   : > { %s848_s29 = scalar_lea.hbm %s1115_s24, 2048  ;;  %p850_p0 = pneg %p1119_p11 }
  0x49   : > { %p849_p12 = scmp.ne.s32.totalorder %s1115_s24, %s848_s29  ;;  %s853_s5 = scalar_lea.hbm %s1236_s0, 4096 }
  0x4a   : > { %p854_p13 = scmp.lt.u32.totalorder %s1115_s24, %s1236_s0  ;;  %p855_p6 = scmp.lt.u32.totalorder %s853_s5, %s848_s29 }
  0x4b   : > { %p851_p1 = pnand %p850_p0, %p849_p12  ;;  %p857_p3 = scmp.lt.u32.totalorder %s848_s29, %s1115_s24 }
  0x4c   : > { %p856_p10 = por %p855_p6, %p854_p13 }
  0x4d   : > { %p852_p2 = pneg %p851_p1 }
  0x4e   : > { %p858_p7 = por %p857_p3, %p856_p10 }
  0x50   : > { %p859_p9 = pnand %p858_p7, %p852_p2 }
  0x52   : > { %862 = shalt.err (!%p859_p9)
}
  0x53   : > { %s863_s10 = scalar_lea.vmem %s1117_s27, 2048  ;;  %s954_s17 = smov [#allocation2]  }
  0x54   : > { %p864_p12 = scmp.ne.s32.totalorder %s1117_s27, %s863_s10  ;;  %s868_s21 = sshll.u32 %s954_s17, 4  ;;  %s869_s21 = int_to_ptr.vmem [resolvable:$false] %s868_s21 }
  0x55   : > { %s870_s26 = scalar_lea.vmem %s869_s21, 4096  ;;  %p871_p4 = scmp.lt.s32.totalorder %s1117_s27, %s869_s21 }
  0x56   : > { %p866_p1 = pnand %p864_p12, %p850_p0  ;;  %p872_p13 = scmp.lt.s32.totalorder %s870_s26, %s863_s10 }
  0x58   : > { %p867_p5 = pneg %p866_p1  ;;  %p873_p6 = por %p872_p13, %p871_p4 }
  0x5a   : > { %p874_p10 = pnand %p873_p6, %p867_p5 }
  0x5c   : > { %877 = shalt.err (!%p874_p10)
}
  0x5d   : > { %722 = dma.hbm_to_vmem [thread:$0]  (!%p1119_p11), %s1115_s24, 2048, %s1117_s27, %s1123_s22, %s952_s7, %s952_s7, %s953_s8  }
  0x5e   : > { %179 = sbr.rel (%p1019_p8) target bundleno = 951 (0x3b7), region = 32  ;;  %s1157_s29 = sand.u32 (!%p1019_p8), 1, %s940_s13  }
  0x5f   : > { %s550_s30 = sshll.u32 (!%p1019_p8), %s1157_s29, 7  ;;  %s182_s23 = scalar_lea.sflag (!%p1019_p8), [#allocation3], %s1157_s29 }
  0x60   : > { %s1161_s5 = scalar_lea.vmem (!%p1019_p8), [#allocation2], %s550_s30  ;;  %p1250_p4 = scmp.ne.s32.totalorder (!%p1019_p8), %s1243_s18, 0 }
  0x65   : > { %923 = dma.done.wait (%p1250_p4), %s182_s23, 2048  }
  0x66   : > { %925 = vsyncadd (%p1250_p4), %s182_s23, 4294965248  ;;  %p1251_p5 = scmp.eq.s32.totalorder %s1000_s16, 0 }
  0x68   : > { %927 = dma.done.wait (%p1251_p5), [#allocation6], 1152   ;;  %p1252_p8 = pmov %p1251_p5 }
  0x69   : > { %v216_v0 = vld [vmem:[%s1161_s5] sm:$0xff]  ;;  %v217_v1 = vld [vmem:[%s1161_s5 + $0x8] sm:$0xff]  ;;  %v218_v2 = vld [vmem:[%s1161_s5 + $0x10] sm:$0xff]  ;;  %v955_v32 = vmov 0.0|0.0   ;;  %vm956_vm0 = vmmov 0   ;;  %v957_v33 = vmov 0.0  }
  0x6a   : > { %929 = vsyncadd (%p1252_p8), [#allocation6], 4294966144  ;;  %v656_v3 = vpack.c.bf16 %v217_v1, %v216_v0  ;;  %v219_v4 = vld [vmem:[%s1161_s5 + $0x18] sm:$0xff]  ;;  %v232_v6 = vld [vmem:[#allocation5] sm:$0xff]  ;;  %688 = vmatprep.subr.bf16.mxu1 %v955_v32  ;;  %653 = vmatprep.mubr.msk.f32.mxu1 %vm956_vm0, %v957_v33  ;;  %vm354_vm1 = vcmask 523264   ;;  %s553_s18 = sshll.u32 %s1157_s29, 3 }
  0x6b   : > { %v660_v5 = vpack.c.bf16 %v219_v4, %v218_v2  ;;  %v220_v7 = vld [vmem:[%s1161_s5 + $0x20] sm:$0xff]  ;;  %v221_v8 = vld [vmem:[%s1161_s5 + $0x28] sm:$0xff]  ;;  %625 = vmatprep.mubr.f32.mxu0 %v232_v6  ;;  %v222_v10 = vld [vmem:[%s1161_s5 + $0x30] sm:$0xff]  ;;  %s556_s20 = sshll.u32 %s1000_s16, 7  ;;  %s215_s7 = scalar_lea.vmem [#allocation8], %s553_s18 }
  0x6c   : > { %657 = vmatprep.subr.bf16.mxu0 %v656_v3  ;;  %v664_v9 = vpack.c.bf16 %v221_v8, %v220_v7  ;;  %v223_v11 = vld [vmem:[%s1161_s5 + $0x38] sm:$0xff]  ;;  %v224_v13 = vld [vmem:[%s1161_s5 + $0x40] sm:$0xff]  ;;  %v225_v14 = vld [vmem:[%s1161_s5 + $0x48] sm:$0xff]  ;;  %s452_s8 = sshll.u32 %s215_s7, 4  ;;  %s1192_s28 = scalar_lea.hbm %s1239_s3, %s556_s20  ;;  %s1194_s8 = int_to_ptr.vmem [resolvable:$true] %s452_s8 }
  0x6d   : > { %659 = vmatpush3.bf16.xpose.msra.mxu0 %v656_v3  ;;  %v668_v12 = vpack.c.bf16 %v223_v11, %v222_v10  ;;  %v672_v15 = vpack.c.bf16 %v225_v14, %v224_v13  ;;  %v226_v16 = vld [vmem:[%s1161_s5 + $0x50] sm:$0xff]  ;;  %v227_v17 = vld [vmem:[%s1161_s5 + $0x58] sm:$0xff]  ;;  %v228_v19 = vld [vmem:[%s1161_s5 + $0x60] sm:$0xff]  ;;  %s439_s22 = scalar_lea.sflag [#allocation4], %s1157_s29  ;;  %s878_s11 = scalar_lea.vmem %s1194_s8, 128 }
  0x6e   : > { %661 = vmatprep.subr.bf16.mxu0 %v660_v5  ;;  %v676_v18 = vpack.c.bf16 %v227_v17, %v226_v16  ;;  %v229_v20 = vld [vmem:[%s1161_s5 + $0x68] sm:$0xff]  ;;  %v230_v22 = vld [vmem:[%s1161_s5 + $0x70] sm:$0xff]  ;;  %v231_v23 = vld [vmem:[%s1161_s5 + $0x78] sm:$0xff]  ;;  %p879_p11 = scmp.ne.s32.totalorder %s1194_s8, %s878_s11  ;;  %p1253_p0 = scmp.ne.s32.totalorder %s1248_s6, 0 }
  0x6f   : > { %v680_v21 = vpack.c.bf16 %v229_v20, %v228_v19  ;;  %v684_v24 = vpack.c.bf16 %v231_v23, %v230_v22  ;;  %v233_v25 = vld [vmem:[#allocation5 + $0x8] sm:$0xff]  ;;  %v234_v26 = vld [vmem:[#allocation5 + $0x10] sm:$0xff]  ;;  %v235_v27 = vld [vmem:[#allocation5 + $0x18] sm:$0xff]  ;;  %s958_s16 = smov [#allocation8]  }
  0x70   : > { %v236_v28 = vld [vmem:[#allocation5 + $0x20] sm:$0xff]  ;;  %v237_v29 = vld [vmem:[#allocation5 + $0x28] sm:$0xff]  ;;  %v238_v30 = vld [vmem:[#allocation5 + $0x30] sm:$0xff]  ;;  %p880_p2 = pnand %p879_p11, %p1253_p0  ;;  %s882_s25 = sshll.u32 %s958_s16, 4  ;;  %s883_s25 = int_to_ptr.vmem [resolvable:$false] %s882_s25 }
  0x71   : > { %v239_v31 = vld [vmem:[#allocation5 + $0x38] sm:$0xff]  ;;  %v240_v54 = vld [vmem:[#allocation7] sm:$0xff]  ;;  %s884_s10 = scalar_lea.vmem %s883_s25, 256  ;;  %p885_p7 = scmp.lt.s32.totalorder %s1194_s8, %s883_s25 }
  0x72   : > { %p881_p3 = pneg %p880_p2  ;;  %p886_p9 = scmp.lt.s32.totalorder %s884_s10, %s878_s11 }
  0x74   : > { %p887_p12 = por %p886_p9, %p885_p7 }
  0x75   : > { %663 = vmatpush3.bf16.xpose.msra.mxu0 %v660_v5 }
  0x76   : > { %665 = vmatprep.subr.bf16.mxu0 %v664_v9  ;;  %p888_p1 = pnand %p887_p12, %p881_p3 }
  0x7d   : > { %667 = vmatpush3.bf16.xpose.msra.mxu0 %v664_v9 }
  0x7e   : > { %669 = vmatprep.subr.bf16.mxu0 %v668_v12 }
  0x85   : > { %671 = vmatpush3.bf16.xpose.msra.mxu0 %v668_v12 }
  0x86   : > { %673 = vmatprep.subr.bf16.mxu0 %v672_v15 }
  0x8d   : > { %675 = vmatpush3.bf16.xpose.msra.mxu0 %v672_v15 }
  0x8e   : > { %677 = vmatprep.subr.bf16.mxu0 %v676_v18 }
  0x95   : > { %679 = vmatpush3.bf16.xpose.msra.mxu0 %v676_v18 }
  0x96   : > { %681 = vmatprep.subr.bf16.mxu0 %v680_v21 }
  0x9d   : > { %683 = vmatpush3.bf16.xpose.msra.mxu0 %v680_v21 }
  0x9e   : > { %685 = vmatprep.subr.bf16.mxu0 %v684_v24 }
  0xa5   : > { %687 = vmatpush3.bf16.xpose.msra.mxu0 %v684_v24 }
  0xac   : > { %626 = vmatmul.mubr.f32.vlgmr.msra.gmra.mrb[0].mxu0 %v233_v25 }
  0xad   : > { %628 = vmatprep.mubr.f32.mxu0 %v234_v26 }
  0xb0   : > { %629 = vmatmul.mubr.f32.gmra.mrb[2].mxu0 %v235_v27 }
  0xb1   : > { %631 = vmatprep.mubr.f32.mxu0 %v236_v28 }
  0xb4   : > { %632 = vmatmul.mubr.f32.gmra.mrb[4].mxu0 %v237_v29 }
  0xb5   : > { %634 = vmatprep.mubr.f32.mxu0 %v238_v30 }
  0xb8   : > { %635 = vmatmul.mubr.f32.gmra.mrb[6].mxu0 %v239_v31 }
 0x17f   : > { %v627_v34 = vpop.f32.mrb[0].mxu0 }
 0x180   : > { %772 = vtanh.f32 %v627_v34  ;;  %v307_v35 = vpop.f32.mrb[1].mxu0 }
 0x181   : > { %774 = vtanh.f32 %v307_v35 }
 0x183   : > { %v630_v36 = vpop.f32.mrb[2].mxu0 }
 0x184   : > { %776 = vtanh.f32 %v630_v36  ;;  %v317_v37 = vpop.f32.mrb[3].mxu0 }
 0x185   : > { %778 = vtanh.f32 %v317_v37 }
 0x187   : > { %v633_v38 = vpop.f32.mrb[4].mxu0 }
 0x188   : > { %780 = vtanh.f32 %v633_v38  ;;  %v327_v39 = vpop.f32.mrb[5].mxu0 }
 0x189   : > { %782 = vtanh.f32 %v327_v39 }
 0x18a   : > { %v773_v40 = vpop.eup %772 }
 0x18b   : > { %v775_v41 = vpop.eup %774  ;;  %v636_v42 = vpop.f32.mrb[6].mxu0 }
 0x18c   : > { %784 = vtanh.f32 %v636_v42  ;;  %v337_v43 = vpop.f32.mrb[7].mxu0  ;;  %v689_v44 = vpack.c.bf16 %v773_v40, %v775_v41 }
 0x18d   : > { %786 = vtanh.f32 %v337_v43 }
 0x18e   : > { %v777_v45 = vpop.eup %776  ;;  %690 = vmatpush3.bf16.msra.mxu1 %v689_v44 }
 0x18f   : > { %v779_v46 = vpop.eup %778  ;;  %691 = vmatprep.subr.bf16.mxu1 %v955_v32 }
 0x190   : > { %v692_v47 = vpack.c.bf16 %v777_v45, %v779_v46 }
 0x192   : > { %v781_v48 = vpop.eup %780  ;;  %693 = vmatpush3.bf16.msra.mxu1 %v692_v47 }
 0x193   : > { %v783_v49 = vpop.eup %782  ;;  %694 = vmatprep.subr.bf16.mxu1 %v955_v32 }
 0x194   : > { %v695_v50 = vpack.c.bf16 %v781_v48, %v783_v49 }
 0x196   : > { %v785_v51 = vpop.eup %784  ;;  %696 = vmatpush3.bf16.msra.mxu1 %v695_v50 }
 0x197   : > { %v787_v52 = vpop.eup %786  ;;  %697 = vmatprep.subr.bf16.mxu1 %v955_v32 }
 0x198   : > { %v698_v53 = vpack.c.bf16 %v785_v51, %v787_v52 }
 0x19a   : > { %699 = vmatpush3.bf16.msra.mxu1 %v698_v53 }
 0x19d   : > { %654 = vmatmul.mubr.msk.f32.vlgmr.msra.gmra.mrb[0].mxu1 %vm354_vm1, %v240_v54 }
 0x270   : > { %v424_v55 = vpop.f32.mrb[0].mxu1 }
 0x271   : > { %428 = vmax.xlane.f32.xlu0 %v424_v55  ;;  %v655_v56 = vpop.f32.mrb[1].mxu1 }
 0x2fe   : > { %v429_v57 = vpop.xlane.xlu0 %428 }
 0x2ff   : > { %v430_v58 = vsub.f32 %v424_v55, %v429_v57 }
 0x301   : > { %v431_v59 = vmul.f32 1.442695, %v430_v58 }
 0x303   : > { %788 = vpow2.f32 %v431_v59 }
 0x30d   : > { %v789_v60 = vpop.eup %788 }
 0x30e   : > { %433 = vadd.xlane.f32.xlu0 %v789_v60 }
 0x39b   : > { %v434_v61 = vpop.xlane.xlu0 %433 }
 0x39c   : > { %790 = vrcp.f32 %v434_v61 }
 0x3a6   : > { %v791_v62 = vpop.eup %790 }
 0x3a7   : > { %v436_v63 = vmul.f32 %v791_v62, %v789_v60 }
 0x3a9   : > { %437 = vst [vmem:[%s215_s7] sm:$0xff] %v436_v63 }
 0x3aa   : > { %891 = shalt.err (!%p888_p1)
}
 0x3ab   : > { %s892_s17 = scalar_lea.hbm %s1192_s28, 128  ;;  %s896_s29 = scalar_lea.hbm %s1239_s3, 256 }
 0x3ac   : > { %p893_p13 = scmp.ne.s32.totalorder %s1192_s28, %s892_s17  ;;  %p897_p4 = scmp.lt.u32.totalorder %s1192_s28, %s1239_s3 }
 0x3ad   : > { %p898_p5 = scmp.lt.u32.totalorder %s896_s29, %s892_s17  ;;  %p900_p11 = scmp.lt.u32.totalorder %s892_s17, %s1192_s28 }
 0x3ae   : > { %p894_p6 = pnand %p893_p13, %p1253_p0 }
 0x3af   : > { %p899_p8 = por %p898_p5, %p897_p4 }
 0x3b0   : > { %p895_p10 = pneg %p894_p6 }
 0x3b1   : > { %p901_p2 = por %p900_p11, %p899_p8 }
 0x3b3   : > { %p902_p3 = pnand %p901_p2, %p895_p10 }
 0x3b5   : > { %905 = shalt.err (!%p902_p3)
}
 0x3b6   : > { %710 = dma.vmem_to_hbm [thread:$0]  (%p1253_p0), %s1194_s8, 128, %s1192_s28, %s439_s22  }
 0x3b7 PF: > { %s464_s5 = sand.u32 1, %s936_s12   ;;  %p1254_p7 = scmp.ne.s32.totalorder %s1244_s19, 0 }
 0x3b8   : > { %p1255_p9 = scmp.ge.s32.totalorder %s948_s15, 2  ;;  %s465_s18 = scalar_lea.sflag [#allocation4], %s464_s5 }
 0x3ba   : > { %p724_p12 = pnand %p1255_p9, %p1254_p7 }
 0x3bc   : > { %931 = dma.done.wait (!%p724_p12), %s465_s18, 128  }
 0x3bd   : > { %933 = vsyncadd (!%p724_p12), %s465_s18, 4294967168  ;;  %p17_p1 = scmp.ge.s32.totalorder %s1092_s4, 4   ;;  %s1256_s12 = smov %s940_s13 }
 0x3be   : > { %s1257_s13 = smov %s944_s14  ;;  %s1258_s14 = smov %s1108_s9 }
 0x3bf   : > { %s1259_s15 = smov %s1092_s4  ;;  %19 = sbr.rel (!%p17_p1) target bundleno = 6 (0x6), region = 85 }
 0x3c6   :  { %470 = vsyncpa [#allocation3], 1 }
 0x3c7   :  { %472 = vsyncpa [#allocation3 + $0x1], 1 }
 0x3c8   :  { %473 = vsyncpa [#allocation6], 1 }
 0x3c9   :  { %474 = vsyncpa [#allocation4], 1 }
 0x3ca   :  { %476 = vsyncpa [#allocation4 + $0x1], 1 }

</bundles_post_ra>
